<compile_context>
chip_gen: v7x
topology: tpu7x:2x2x1
jax: 0.10.0
libtpu: 0.0.40
codegen_flags: <defaults>
</compile_context>

<pallas_src>
import functools

import jax
import jax.numpy as jnp
from jax import lax
from jax.experimental import pallas as pl
from jax.experimental.pallas import tpu as pltpu


def _round_up(x, m):
    return ((x + m - 1) // m) * m


def _fused_mlp_kernel(x_ref, *refs, n_layers: int):
    """Fused MLP for one (tm, K) activation tile.

    refs = (w0, b0, w1, b1, ..., w_{L-1}, b_{L-1}, o_ref).
    Hidden layers apply ReLU; the final layer does not. Only the final
    activation is written back (lane-dense, padded out dim).
    """
    o_ref = refs[-1]
    act = x_ref[...]
    for li in range(n_layers):
        w = refs[2 * li][...]
        b = refs[2 * li + 1][...]          # (1, N) broadcast add (VPU)
        # NOTE: for large, compute-bound M cast act/w to bf16 here and keep the
        # f32 accumulate; at these sizes f32 inputs are fine and exact.
        act = jnp.dot(act, w, preferred_element_type=jnp.float32) + b
        if li != n_layers - 1:
            act = jnp.maximum(act, 0.0)    # ReLU on hidden layers only
    o_ref[...] = act.astype(o_ref.dtype)


def mlp_pallas(x2d, params, *, tm_max=512):
    """x2d: (M, in_channels) f32; params: list of (w:(K,N), b:(N,)) f32."""
    M, K = x2d.shape
    n_layers = len(params)
    assert n_layers >= 1

    # --- Lane-dense output: pad the last layer's out dim to a multiple of 128.
    w_last, b_last = params[-1]
    n_out = w_last.shape[1]
    n_lane = _round_up(n_out, 128)
    if n_lane != n_out:
        w_last = jnp.pad(w_last, ((0, 0), (0, n_lane - n_out)))
        b_last = jnp.pad(b_last, (0, n_lane - n_out))
    padded_params = list(params[:-1]) + [(w_last, b_last)]

    # --- M tiling: tm a multiple of 8, capped so double-buffered activation
    #     tiles + resident weights stay well inside the scoped VMEM limit on
    #     every generation (v5e 16 MiB / v6e 32 MiB / v7x 32 MiB defaults).
    tm = min(tm_max, _round_up(M, 8))
    m_pad = _round_up(M, tm)
    if m_pad != M:
        x2d = jnp.pad(x2d, ((0, m_pad - M), (0, 0)))

    # --- Flat arg list + specs: x is M-tiled; every (w, b) uses a constant
    #     index_map so it is resident (no re-DMA) across the grid.
    args = [x2d]
    in_specs = [pl.BlockSpec((tm, K), lambda i: (i, 0))]
    for (w, b) in padded_params:
        kin, kout = w.shape
        args.append(w)
        in_specs.append(pl.BlockSpec((kin, kout), lambda i: (0, 0)))
        args.append(b.reshape(1, kout))
        in_specs.append(pl.BlockSpec((1, kout), lambda i: (0, 0)))

    kernel = functools.partial(_fused_mlp_kernel, n_layers=n_layers)
    out = pl.pallas_call(
        kernel,
        out_shape=jax.ShapeDtypeStruct((m_pad, n_lane), jnp.float32),
        grid=(m_pad // tm,),
        in_specs=in_specs,
        out_specs=pl.BlockSpec((tm, n_lane), lambda i: (i, 0)),
        compiler_params=pltpu.CompilerParams(
            dimension_semantics=("parallel",),   # M tiles are independent
        ),
    )(*args)
    return out[:M, :n_out]


def init_params(key, in_channels, hidden_layers, out_channels):
    """Deterministic init mimicking nn.Linear default (uniform +-1/sqrt(fan_in)).

    Weights stored as (fan_in, fan_out), i.e. transposed vs. PyTorch.
    """
    params = []
    prev = in_channels
    dims = list(hidden_layers) + [out_channels]
    for d in dims:
        key, kw, kb = jax.random.split(key, 3)
        bound = 1.0 / (prev ** 0.5)
        w = jax.random.uniform(kw, (prev, d), jnp.float32, -bound, bound)
        b = jax.random.uniform(kb, (d,), jnp.float32, -bound, bound)
        params.append((w, b))
        prev = d
    return params


def learning_forward(x, params, in_channels):
    """Equivalent of learning.forward: flatten to (-1, in_channels), fused MLP."""
    x2d = x.reshape(-1, in_channels).astype(jnp.float32)
    return mlp_pallas(x2d, params)


def learning_forward_ref(x, params, in_channels):
    out = x.reshape(-1, in_channels).astype(jnp.float32)
    n_layers = len(params)
    for li, (w, b) in enumerate(params):
        out = jnp.dot(out, w, precision=lax.Precision.HIGHEST) + b
        if li != n_layers - 1:
            out = jnp.maximum(out, 0.0)
    return out


if __name__ == "__main__":
    key = jax.random.PRNGKey(0)
    in_channels = 32
    hidden_layers = [64, 32]
    out_channels = 4

    key, kx = jax.random.split(key)
    # input: (2, 4, 32) -> view(-1, 32) = (8, 32)
    x = jax.random.normal(kx, (2, 4, in_channels), jnp.float32)

    params = init_params(key, in_channels, hidden_layers, out_channels)

    out = learning_forward(x, params, in_channels)
    out = jax.block_until_ready(out)

    ref = learning_forward_ref(x, params, in_channels)
    assert out.shape == (8, out_channels), out.shape
    assert jnp.allclose(out, ref, atol=1e-5, rtol=1e-5), "mismatch vs reference"

    print("KERNEL_OK")
</pallas_src>

<mosaic_0001>
module attributes {stable_mosaic.version = 11 : i64} {
  func.func @_fused_mlp_kernel(%arg0: i32, %arg1: memref<8x32xf32, #tpu.memory_space<vmem>>, %arg2: memref<32x64xf32, #tpu.memory_space<vmem>>, %arg3: memref<1x64xf32, #tpu.memory_space<vmem>>, %arg4: memref<64x32xf32, #tpu.memory_space<vmem>>, %arg5: memref<1x32xf32, #tpu.memory_space<vmem>>, %arg6: memref<32x128xf32, #tpu.memory_space<vmem>>, %arg7: memref<1x128xf32, #tpu.memory_space<vmem>>, %arg8: memref<8x128xf32, #tpu.memory_space<vmem>>) attributes {dimension_semantics = [#tpu.dimension_semantics<parallel>], iteration_bounds = array<i64: 1>, scalar_prefetch = 0 : i64, scratch_operands = 0 : i64, tpu.core_type = #tpu.core_type<tc>, window_params = [{transform_indices = @transform_0, window_bounds = array<i64: 8, 32>}, {pipeline_mode = #tpu.pipeline_mode<synchronous>, transform_indices = @transform_1, window_bounds = array<i64: 32, 64>}, {pipeline_mode = #tpu.pipeline_mode<synchronous>, transform_indices = @transform_2, window_bounds = array<i64: 1, 64>}, {pipeline_mode = #tpu.pipeline_mode<synchronous>, transform_indices = @transform_3, window_bounds = array<i64: 64, 32>}, {pipeline_mode = #tpu.pipeline_mode<synchronous>, transform_indices = @transform_4, window_bounds = array<i64: 1, 32>}, {pipeline_mode = #tpu.pipeline_mode<synchronous>, transform_indices = @transform_5, window_bounds = array<i64: 32, 128>}, {pipeline_mode = #tpu.pipeline_mode<synchronous>, transform_indices = @transform_6, window_bounds = array<i64: 1, 128>}, {transform_indices = @transform_7, window_bounds = array<i64: 8, 128>}]} {
    %c0 = arith.constant 0 : index
    %c0_0 = arith.constant 0 : index
    %0 = vector.load %arg1[%c0, %c0_0] : memref<8x32xf32, #tpu.memory_space<vmem>>, vector<8x32xf32>
    %c0_1 = arith.constant 0 : index
    %c0_2 = arith.constant 0 : index
    %1 = vector.load %arg2[%c0_1, %c0_2] : memref<32x64xf32, #tpu.memory_space<vmem>>, vector<32x64xf32>
    %c0_3 = arith.constant 0 : index
    %c0_4 = arith.constant 0 : index
    %2 = vector.load %arg3[%c0_3, %c0_4] : memref<1x64xf32, #tpu.memory_space<vmem>>, vector<1x64xf32>
    %cst = arith.constant dense<0.000000e+00> : vector<8x64xf32>
    %3 = tpu.matmul %0, %1, %cst {dimension_numbers = #tpu.dot_dimension_numbers<[1], [0], [0], [1], [0, 0, 1, 1], [], []>} : vector<8x32xf32>, vector<32x64xf32>, vector<8x64xf32> -> vector<8x64xf32>
    %4 = vector.broadcast %2 : vector<1x64xf32> to vector<8x64xf32>
    %5 = arith.addf %3, %4 : vector<8x64xf32>
    %cst_5 = arith.constant 0.000000e+00 : f32
    %6 = vector.broadcast %cst_5 : f32 to vector<8x64xf32>
    %7 = arith.maximumf %5, %6 : vector<8x64xf32>
    %c0_6 = arith.constant 0 : index
    %c0_7 = arith.constant 0 : index
    %8 = vector.load %arg4[%c0_6, %c0_7] : memref<64x32xf32, #tpu.memory_space<vmem>>, vector<64x32xf32>
    %c0_8 = arith.constant 0 : index
    %c0_9 = arith.constant 0 : index
    %9 = vector.load %arg5[%c0_8, %c0_9] : memref<1x32xf32, #tpu.memory_space<vmem>>, vector<1x32xf32>
    %cst_10 = arith.constant dense<0.000000e+00> : vector<8x32xf32>
    %10 = tpu.matmul %7, %8, %cst_10 {dimension_numbers = #tpu.dot_dimension_numbers<[1], [0], [0], [1], [0, 0, 1, 1], [], []>} : vector<8x64xf32>, vector<64x32xf32>, vector<8x32xf32> -> vector<8x32xf32>
    %11 = vector.broadcast %9 : vector<1x32xf32> to vector<8x32xf32>
    %12 = arith.addf %10, %11 : vector<8x32xf32>
    %cst_11 = arith.constant 0.000000e+00 : f32
    %13 = vector.broadcast %cst_11 : f32 to vector<8x32xf32>
    %14 = arith.maximumf %12, %13 : vector<8x32xf32>
    %c0_12 = arith.constant 0 : index
    %c0_13 = arith.constant 0 : index
    %15 = vector.load %arg6[%c0_12, %c0_13] : memref<32x128xf32, #tpu.memory_space<vmem>>, vector<32x128xf32>
    %c0_14 = arith.constant 0 : index
    %c0_15 = arith.constant 0 : index
    %16 = vector.load %arg7[%c0_14, %c0_15] : memref<1x128xf32, #tpu.memory_space<vmem>>, vector<1x128xf32>
    %cst_16 = arith.constant dense<0.000000e+00> : vector<8x128xf32>
    %17 = tpu.matmul %14, %15, %cst_16 {dimension_numbers = #tpu.dot_dimension_numbers<[1], [0], [0], [1], [0, 0, 1, 1], [], []>} : vector<8x32xf32>, vector<32x128xf32>, vector<8x128xf32> -> vector<8x128xf32>
    %18 = vector.broadcast %16 : vector<1x128xf32> to vector<8x128xf32>
    %19 = arith.addf %17, %18 : vector<8x128xf32>
    %c0_17 = arith.constant 0 : index
    %c0_18 = arith.constant 0 : index
    %20 = vector.load %arg8[%c0_17, %c0_18] : memref<8x128xf32, #tpu.memory_space<vmem>>, vector<8x128xf32>
    tpu.vector_store %arg8[%c0_17, %c0_18], %19 {strides = array<i32>} : memref<8x128xf32, #tpu.memory_space<vmem>>, vector<8x128xf32>,
    return
  }
  func.func @transform_0(%arg0: i32) -> (i32, i32) {
    %c0_i32 = arith.constant 0 : i32
    %c0_i32_0 = arith.constant 0 : i32
    return %arg0, %c0_i32 : i32, i32
  }
  func.func @transform_1(%arg0: i32) -> (i32, i32) {
    %c0_i32 = arith.constant 0 : i32
    %c0_i32_0 = arith.constant 0 : i32
    %c0_i32_1 = arith.constant 0 : i32
    return %c0_i32, %c0_i32_0 : i32, i32
  }
  func.func @transform_2(%arg0: i32) -> (i32, i32) {
    %c0_i32 = arith.constant 0 : i32
    %c0_i32_0 = arith.constant 0 : i32
    %c0_i32_1 = arith.constant 0 : i32
    return %c0_i32, %c0_i32_0 : i32, i32
  }
  func.func @transform_3(%arg0: i32) -> (i32, i32) {
    %c0_i32 = arith.constant 0 : i32
    %c0_i32_0 = arith.constant 0 : i32
    %c0_i32_1 = arith.constant 0 : i32
    return %c0_i32, %c0_i32_0 : i32, i32
  }
  func.func @transform_4(%arg0: i32) -> (i32, i32) {
    %c0_i32 = arith.constant 0 : i32
    %c0_i32_0 = arith.constant 0 : i32
    %c0_i32_1 = arith.constant 0 : i32
    return %c0_i32, %c0_i32_0 : i32, i32
  }
  func.func @transform_5(%arg0: i32) -> (i32, i32) {
    %c0_i32 = arith.constant 0 : i32
    %c0_i32_0 = arith.constant 0 : i32
    %c0_i32_1 = arith.constant 0 : i32
    return %c0_i32, %c0_i32_0 : i32, i32
  }
  func.func @transform_6(%arg0: i32) -> (i32, i32) {
    %c0_i32 = arith.constant 0 : i32
    %c0_i32_0 = arith.constant 0 : i32
    %c0_i32_1 = arith.constant 0 : i32
    return %c0_i32, %c0_i32_0 : i32, i32
  }
  func.func @transform_7(%arg0: i32) -> (i32, i32) {
    %c0_i32 = arith.constant 0 : i32
    %c0_i32_0 = arith.constant 0 : i32
    return %arg0, %c0_i32 : i32, i32
  }
}

</mosaic_0001>

<bundles_post_ra>
// kernel: tpu_custom_call.1
= control target key start
LH: loop header
LB: loop body
LE: loop exit
PB: predicated region body
PF: predicated region fallthrough
CT: control target
= control target key end

     0   :  { %v421_v3 = vmov 0.0|0.0   ;;  %vm422_vm0 = vmmov 0   ;;  %v423_v6 = vmov 0.0   ;;  %s542_s0 = inlined_call_operand.vmem [shape: f32[8,32], index: 0, kind: input, shape index: {}]   ;;  %s543_s1 = inlined_call_operand.vmem [shape: f32[32,64], index: 1, kind: input, shape index: {}]   ;;  %s544_s2 = inlined_call_operand.vmem [shape: f32[1,64], index: 2, kind: input, shape index: {}]   ;;  %s545_s3 = inlined_call_operand.vmem [shape: f32[64,32], index: 3, kind: input, shape index: {}]   ;;  %s546_s4 = inlined_call_operand.vmem [shape: f32[1,32], index: 4, kind: input, shape index: {}]   ;;  %s547_s5 = inlined_call_operand.vmem [shape: f32[32,128], index: 5, kind: input, shape index: {}]   ;;  %s548_s6 = inlined_call_operand.vmem [shape: f32[1,128], index: 6, kind: input, shape index: {}]   ;;  %s549_s7 = inlined_call_operand.hbm [shape: f32[8,128], index: 7, kind: output, shape index: {}]  }
   0x1   :  { %v28_v0 = vld [vmem:[%s543_s1] sm:$0xff]  ;;  %v29_v1 = vld [vmem:[%s543_s1 + $0x8] sm:$0xff]  ;;  %v30_v2 = vld [vmem:[%s543_s1 + $0x10] sm:$0xff]  ;;  %369 = vmatprep.subr.bf16.mxu0 %v421_v3  ;;  %336 = vmatprep.mubr.msk.f32.mxu0 %vm422_vm0, %v423_v6 }
   0x2   :  { %v370_v4 = vpack.c.bf16 %v29_v1, %v28_v0  ;;  %v31_v5 = vld [vmem:[%s543_s1 + $0x18] sm:$0xff]  ;;  %v114_v7 = vld [vmem:[%s545_s3] sm:$0xff]  ;;  %375 = vmatprep.subr.bf16.mxu1 %v421_v3  ;;  %v115_v8 = vld [vmem:[%s545_s3 + $0x8] sm:$0xff]  ;;  %355 = vmatprep.mubr.msk.f32.mxu1 %vm422_vm0, %v423_v6 }
   0x3   :  { %v116_v9 = vld [vmem:[%s545_s3 + $0x10] sm:$0xff]  ;;  %v117_v10 = vld [vmem:[%s545_s3 + $0x18] sm:$0xff]  ;;  %v373_v11 = vpack.c.bf16 %v31_v5, %v30_v2  ;;  %v376_v12 = vpack.c.bf16 %v115_v8, %v114_v7 }
   0x4   :  { %371 = vmatpush3.bf16.msra.mxu0 %v370_v4 }
   0x5   :  { %372 = vmatprep.subr.bf16.mxu0 %v421_v3 }
   0x6   :  { %12 = vsyncpa [#allocation3], 0  ;;  %377 = vmatpush3.bf16.msra.mxu1 %v376_v12  ;;  %v379_v13 = vpack.c.bf16 %v117_v10, %v116_v9  ;;  %v118_v14 = vld [vmem:[%s545_s3 + $0x20] sm:$0xff]  ;;  %v119_v15 = vld [vmem:[%s545_s3 + $0x28] sm:$0xff]  ;;  %vm39_vm1 = vcmask 261120   ;;  %vm129_vm2 = vcmask 523264  }
   0x7   :  { %378 = vmatprep.subr.bf16.mxu1 %v421_v3  ;;  %v27_v16 = vld [vmem:[%s542_s0] sm:$0xff]  ;;  %v382_v17 = vpack.c.bf16 %v119_v15, %v118_v14  ;;  %v120_v18 = vld [vmem:[%s545_s3 + $0x30] sm:$0xff]  ;;  %v121_v19 = vld [vmem:[%s545_s3 + $0x38] sm:$0xff]  ;;  %s424_s14 = smov [#allocation2]  }
   0x8   :  { %374 = vmatpush3.bf16.msra.mxu0 %v373_v11  ;;  %v385_v20 = vpack.c.bf16 %v121_v19, %v120_v18  ;;  %v204_v21 = vld [vmem:[%s547_s5] sm:$0xff]  ;;  %v205_v22 = vld [vmem:[%s547_s5 + $0x8] sm:$0xff]  ;;  %v206_v29 = vld [vmem:[%s547_s5 + $0x10] sm:$0xff]  ;;  %s295_s15 = sshll.u32 %s424_s14, 4  ;;  %s296_s15 = int_to_ptr.vmem [resolvable:$true] %s295_s15 }
   0x9   :  { %387 = vmatprep.subr.bf16.mxu0 %v421_v3  ;;  %v388_v23 = vpack.c.bf16 %v205_v22, %v204_v21  ;;  %v303_v24 = vld [vmem:[%s544_s2] ss:$0 sm:$0xff]  ;;  %v207_v30 = vld [vmem:[%s547_s5 + $0x18] sm:$0xff]  ;;  %s397_s5 = scalar_lea.vmem %s296_s15, 128  ;;  %p402_p1 = scmp.lt.s32.totalorder %s296_s15, %s296_s15 }
   0xa   :  { %380 = vmatpush3.bf16.msra.mxu1 %v379_v13  ;;  %v391_v31 = vpack.c.bf16 %v207_v30, %v206_v29  ;;  %v305_v32 = vld [vmem:[%s546_s4] ss:$0 sm:$0xff]  ;;  %p398_p0 = scmp.ne.s32.totalorder %s296_s15, %s397_s5  ;;  %p403_p2 = scmp.lt.s32.totalorder %s397_s5, %s397_s5 }
   0xb   :  { %337 = vmatmul.mubr.msk.f32.vlgmr.msra.gmra.mrb[0].mxu0 %vm39_vm1, %v27_v16  ;;  %381 = vmatprep.subr.bf16.mxu1 %v421_v3  ;;  %v307_v37 = vld [vmem:[%s548_s6] ss:$0 sm:$0xff] }
   0xc   :  { %366 = vmatprep.mubr.msk.f32.mxu0 %vm422_vm0, %v423_v6  ;;  %389 = vmatpush3.bf16.msra.mxu0 %v388_v23  ;;  %p404_p3 = por %p403_p2, %p402_p1 }
   0xd   :  { %390 = vmatprep.subr.bf16.mxu0 %v421_v3 }
   0xe   :  { %383 = vmatpush3.bf16.msra.mxu1 %v382_v17  ;;  %p405_p4 = pnand %p404_p3, %p398_p0 }
   0xf   :  { %384 = vmatprep.subr.bf16.mxu1 %v421_v3 }
  0x10   :  { %392 = vmatpush3.bf16.msra.mxu0 %v391_v31 }
  0x12   :  { %386 = vmatpush3.bf16.msra.mxu1 %v385_v20 }
  0xde   :  { %v109_v25 = vpop.f32.mrb[0].mxu0 }
  0xdf   :  { %v110_v26 = vadd.f32 %v303_v24, %v109_v25  ;;  %v338_v27 = vpop.f32.mrb[1].mxu0 }
  0xe1   :  { %v113_v28 = vmax.f32 %v110_v26, 0.0 }
  0xe3   :  { %356 = vmatmul.mubr.msk.f32.vlgmr.msra.gmra.mrb[0].mxu1 %vm129_vm2, %v113_v28 }
 0x1b6   :  { %v199_v33 = vpop.f32.mrb[0].mxu1 }
 0x1b7   :  { %v200_v34 = vadd.f32 %v305_v32, %v199_v33  ;;  %v357_v35 = vpop.f32.mrb[1].mxu1 }
 0x1b9   :  { %v203_v36 = vmax.f32 %v200_v34, 0.0 }
 0x1bb   :  { %367 = vmatmul.mubr.msk.f32.vlgmr.msra.gmra.mrb[2].mxu0 %vm39_vm1, %v203_v36 }
 0x28e   :  { %v284_v38 = vpop.f32.mrb[2].mxu0 }
 0x28f   :  { %v285_v39 = vadd.f32 %v307_v37, %v284_v38  ;;  %v368_v40 = vpop.f32.mrb[3].mxu0 }
 0x291   :  { %288 = vst [vmem:[#allocation2] sm:$0xff] %v285_v39 }
 0x292   :  { %408 = shalt.err (!%p405_p4)
}
 0x293   :  { %s409_s1 = scalar_lea.hbm %s549_s7, 128 }
 0x294   :  { %p410_p5 = scmp.ne.s32.totalorder %s549_s7, %s409_s1  ;;  %p413_p6 = scmp.lt.u32.totalorder %s409_s1, %s549_s7 }
 0x296   :  { %p415_p7 = pnand %p413_p6, %p410_p5 }
 0x298   :  { %418 = shalt.err (!%p415_p7)
}
 0x299   :  { %298 = dma.vmem_to_hbm [thread:$0]  %s296_s15, 128, %s549_s7, [#allocation3]  }
 0x29a   :  { %419 = dma.done.wait [#allocation3], 128  }
 0x29b   :  { %420 = vsyncadd [#allocation3], 4294967168 }
 0x29c   :  { %302 = vsyncpa [#allocation3], 1 }

</bundles_post_ra>
